<compile_context>
chip_gen: v5e
topology: v5e:2x2
jax: 0.10.0
libtpu: 0.0.40
codegen_flags: <defaults>
</compile_context>

<pallas_src>
from functools import partial

import jax
import jax.numpy as jnp
from jax.experimental import pallas as pl
from jax.experimental.pallas import tpu as pltpu

LANE = 128          # lane width: pad hidden/output feature dims to this
T_TILE = 256        # rows of stacked timesteps/batch per grid step (MXU-friendly M)


def nkf_mlp_kernel(x_ref, w1_ref, b1_ref, w2_ref, b2_ref, w3_ref, b3_ref, o_ref):
    # Whole MLP hot path in one body: 3 MXU matmuls + VPU bias/relu.
    x = x_ref[...]                                                        # (T_TILE, D_in) f32

    h1 = jnp.dot(x, w1_ref[...], preferred_element_type=jnp.float32) + b1_ref[...]
    h1 = jnp.maximum(h1, 0.0)                                             # relu, (T_TILE, 128)

    h2 = jnp.dot(h1, w2_ref[...], preferred_element_type=jnp.float32) + b2_ref[...]
    h2 = jnp.maximum(h2, 0.0)                                             # relu, (T_TILE, 128)

    out = jnp.dot(h2, w3_ref[...], preferred_element_type=jnp.float32) + b3_ref[...]
    o_ref[...] = out.astype(o_ref.dtype)                                  # lane-dense (T_TILE, 128)


def _pad_params(params):
    """Zero-pad hidden 64->LANE and output ->LANE; padding is numerically inert
    (zero columns stay zero through ReLU and the final matmul ignores zero rows)."""
    w1, b1 = params["w1"], params["b1"]
    w2, b2 = params["w2"], params["b2"]
    w3, b3 = params["w3"], params["b3"]
    H, O = w1.shape[1], w3.shape[1]
    hp, op = LANE - H, LANE - O

    w1p = jnp.pad(w1, ((0, 0), (0, hp)))
    b1p = jnp.pad(b1, ((0, 0), (0, hp)))
    w2p = jnp.pad(w2, ((0, hp), (0, hp)))
    b2p = jnp.pad(b2, ((0, 0), (0, hp)))
    w3p = jnp.pad(w3, ((0, hp), (0, op)))
    b3p = jnp.pad(b3, ((0, 0), (0, op)))
    return w1p, b1p, w2p, b2p, w3p, b3p, O


@jax.jit
def neural_kalman_filter(x, params):
    """x: (N, input_dim) f32 — N stacked timesteps/batch rows.
    params: dict of w1,b1,w2,b2,w3,b3 with hidden=64, out=output_dim."""
    N, D_in = x.shape
    w1p, b1p, w2p, b2p, w3p, b3p, out_dim = _pad_params(params)

    # Pad rows up to a multiple of T_TILE so every grid step sees a full tile.
    n_tiles = pl.cdiv(N, T_TILE)
    N_pad = n_tiles * T_TILE
    x_p = jnp.pad(x, ((0, N_pad - N), (0, 0)))

    resident = lambda a: pl.BlockSpec(a.shape, lambda t: (0, 0))   # DMA once, stay in VMEM

    flops = 2 * N_pad * (D_in * LANE + LANE * LANE + LANE * LANE)
    bytes_accessed = 4 * (
        x_p.size + N_pad * LANE
        + w1p.size + b1p.size + w2p.size + b2p.size + w3p.size + b3p.size
    )

    out_padded = pl.pallas_call(
        nkf_mlp_kernel,
        out_shape=jax.ShapeDtypeStruct((N_pad, LANE), jnp.float32),
        grid_spec=pl.GridSpec(
            grid=(n_tiles,),
            in_specs=[
                pl.BlockSpec((T_TILE, D_in), lambda t: (t, 0)),    # streamed x tile
                resident(w1p), resident(b1p),
                resident(w2p), resident(b2p),
                resident(w3p), resident(b3p),
            ],
            out_specs=pl.BlockSpec((T_TILE, LANE), lambda t: (t, 0)),  # lane-dense store
        ),
        compiler_params=pltpu.CompilerParams(
            dimension_semantics=("parallel",),      # v7x: shard row tiles across both TCs
            vmem_limit_bytes=32 << 20,              # safe on v7x's 64 MiB physical VMEM
        ),
        cost_estimate=pl.CostEstimate(
            flops=flops, transcendentals=0, bytes_accessed=bytes_accessed
        ),
    )(x_p, w1p, b1p, w2p, b2p, w3p, b3p)

    return out_padded[:N, :out_dim]


def init_params(key, input_dim, hidden_dim, output_dim):
    """Deterministic init mimicking nn.Linear's uniform(-1/sqrt(fan_in), 1/sqrt(fan_in))."""
    ks = jax.random.split(key, 6)

    def linear(kw, kb, fan_in, fan_out):
        bound = 1.0 / jnp.sqrt(jnp.float32(fan_in))
        w = jax.random.uniform(kw, (fan_in, fan_out), jnp.float32, -bound, bound)
        b = jax.random.uniform(kb, (1, fan_out), jnp.float32, -bound, bound)
        return w, b

    w1, b1 = linear(ks[0], ks[1], input_dim, hidden_dim)
    w2, b2 = linear(ks[2], ks[3], hidden_dim, hidden_dim)
    w3, b3 = linear(ks[4], ks[5], hidden_dim, output_dim)
    return {"w1": w1, "b1": b1, "w2": w2, "b2": b2, "w3": w3, "b3": b3}


if __name__ == "__main__":
    # Dimensions implied by the module:
    #   input_dim = imu feature dim (6) + dvl dim (3) + pressure dim (1) = 10
    #   hidden_dim = 64, output_dim = ground_truth dim = 3
    # N rows = stacked timesteps (fused into one pallas_call).
    n_rows = 512
    input_dim = 6 + 3 + 1
    hidden_dim = 64
    output_dim = 3

    key = jax.random.PRNGKey(0)
    k_x, k_p = jax.random.split(key)
    x = jax.random.normal(k_x, (n_rows, input_dim), dtype=jnp.float32)
    params = init_params(k_p, input_dim, hidden_dim, output_dim)

    out = neural_kalman_filter(x, params)
    jax.block_until_ready(out)

    # Sanity check against plain-JAX reference (unpadded weights).
    ref = jnp.maximum(x @ params["w1"] + params["b1"], 0.0)
    ref = jnp.maximum(ref @ params["w2"] + params["b2"], 0.0)
    ref = ref @ params["w3"] + params["b3"]
    assert out.shape == (n_rows, output_dim)
    assert jnp.allclose(out, ref, atol=1e-5, rtol=1e-5)

    print("KERNEL_OK")
</pallas_src>

<mosaic_0001>
module attributes {stable_mosaic.version = 11 : i64} {
  func.func @nkf_mlp_kernel(%arg0: i32, %arg1: memref<256x10xf32, #tpu.memory_space<vmem>>, %arg2: memref<10x128xf32, #tpu.memory_space<vmem>>, %arg3: memref<1x128xf32, #tpu.memory_space<vmem>>, %arg4: memref<128x128xf32, #tpu.memory_space<vmem>>, %arg5: memref<1x128xf32, #tpu.memory_space<vmem>>, %arg6: memref<128x128xf32, #tpu.memory_space<vmem>>, %arg7: memref<1x128xf32, #tpu.memory_space<vmem>>, %arg8: memref<256x128xf32, #tpu.memory_space<vmem>>) attributes {dimension_semantics = [#tpu.dimension_semantics<parallel>], iteration_bounds = array<i64: 2>, scalar_prefetch = 0 : i64, scratch_operands = 0 : i64, tpu.core_type = #tpu.core_type<tc>, window_params = [{transform_indices = @transform_0, window_bounds = array<i64: 256, 10>}, {pipeline_mode = #tpu.pipeline_mode<synchronous>, transform_indices = @transform_1, window_bounds = array<i64: 10, 128>}, {pipeline_mode = #tpu.pipeline_mode<synchronous>, transform_indices = @transform_2, window_bounds = array<i64: 1, 128>}, {pipeline_mode = #tpu.pipeline_mode<synchronous>, transform_indices = @transform_3, window_bounds = array<i64: 128, 128>}, {pipeline_mode = #tpu.pipeline_mode<synchronous>, transform_indices = @transform_4, window_bounds = array<i64: 1, 128>}, {pipeline_mode = #tpu.pipeline_mode<synchronous>, transform_indices = @transform_5, window_bounds = array<i64: 128, 128>}, {pipeline_mode = #tpu.pipeline_mode<synchronous>, transform_indices = @transform_6, window_bounds = array<i64: 1, 128>}, {transform_indices = @transform_7, window_bounds = array<i64: 256, 128>}]} {
    %c0 = arith.constant 0 : index
    %c0_0 = arith.constant 0 : index
    %0 = vector.load %arg1[%c0, %c0_0] : memref<256x10xf32, #tpu.memory_space<vmem>>, vector<256x10xf32>
    %c0_1 = arith.constant 0 : index
    %c0_2 = arith.constant 0 : index
    %1 = vector.load %arg2[%c0_1, %c0_2] : memref<10x128xf32, #tpu.memory_space<vmem>>, vector<10x128xf32>
    %cst = arith.constant dense<0.000000e+00> : vector<256x128xf32>
    %2 = tpu.matmul %0, %1, %cst {dimension_numbers = #tpu.dot_dimension_numbers<[1], [0], [0], [1], [0, 0, 1, 1], [], []>} : vector<256x10xf32>, vector<10x128xf32>, vector<256x128xf32> -> vector<256x128xf32>
    %c0_3 = arith.constant 0 : index
    %c0_4 = arith.constant 0 : index
    %3 = vector.load %arg3[%c0_3, %c0_4] : memref<1x128xf32, #tpu.memory_space<vmem>>, vector<1x128xf32>
    %4 = vector.broadcast %3 : vector<1x128xf32> to vector<256x128xf32>
    %5 = arith.addf %2, %4 : vector<256x128xf32>
    %cst_5 = arith.constant 0.000000e+00 : f32
    %6 = vector.broadcast %cst_5 : f32 to vector<256x128xf32>
    %7 = arith.maximumf %5, %6 : vector<256x128xf32>
    %c0_6 = arith.constant 0 : index
    %c0_7 = arith.constant 0 : index
    %8 = vector.load %arg4[%c0_6, %c0_7] : memref<128x128xf32, #tpu.memory_space<vmem>>, vector<128x128xf32>
    %cst_8 = arith.constant dense<0.000000e+00> : vector<256x128xf32>
    %9 = tpu.matmul %7, %8, %cst_8 {dimension_numbers = #tpu.dot_dimension_numbers<[1], [0], [0], [1], [0, 0, 1, 1], [], []>} : vector<256x128xf32>, vector<128x128xf32>, vector<256x128xf32> -> vector<256x128xf32>
    %c0_9 = arith.constant 0 : index
    %c0_10 = arith.constant 0 : index
    %10 = vector.load %arg5[%c0_9, %c0_10] : memref<1x128xf32, #tpu.memory_space<vmem>>, vector<1x128xf32>
    %11 = vector.broadcast %10 : vector<1x128xf32> to vector<256x128xf32>
    %12 = arith.addf %9, %11 : vector<256x128xf32>
    %cst_11 = arith.constant 0.000000e+00 : f32
    %13 = vector.broadcast %cst_11 : f32 to vector<256x128xf32>
    %14 = arith.maximumf %12, %13 : vector<256x128xf32>
    %c0_12 = arith.constant 0 : index
    %c0_13 = arith.constant 0 : index
    %15 = vector.load %arg6[%c0_12, %c0_13] : memref<128x128xf32, #tpu.memory_space<vmem>>, vector<128x128xf32>
    %cst_14 = arith.constant dense<0.000000e+00> : vector<256x128xf32>
    %16 = tpu.matmul %14, %15, %cst_14 {dimension_numbers = #tpu.dot_dimension_numbers<[1], [0], [0], [1], [0, 0, 1, 1], [], []>} : vector<256x128xf32>, vector<128x128xf32>, vector<256x128xf32> -> vector<256x128xf32>
    %c0_15 = arith.constant 0 : index
    %c0_16 = arith.constant 0 : index
    %17 = vector.load %arg7[%c0_15, %c0_16] : memref<1x128xf32, #tpu.memory_space<vmem>>, vector<1x128xf32>
    %18 = vector.broadcast %17 : vector<1x128xf32> to vector<256x128xf32>
    %19 = arith.addf %16, %18 : vector<256x128xf32>
    %c0_17 = arith.constant 0 : index
    %c0_18 = arith.constant 0 : index
    %20 = vector.load %arg8[%c0_17, %c0_18] : memref<256x128xf32, #tpu.memory_space<vmem>>, vector<256x128xf32>
    tpu.vector_store %arg8[%c0_17, %c0_18], %19 {strides = array<i32>} : memref<256x128xf32, #tpu.memory_space<vmem>>, vector<256x128xf32>,
    return
  }
  func.func @transform_0(%arg0: i32) -> (i32, i32) {
    %c0_i32 = arith.constant 0 : i32
    %c0_i32_0 = arith.constant 0 : i32
    return %arg0, %c0_i32 : i32, i32
  }
  func.func @transform_1(%arg0: i32) -> (i32, i32) {
    %c0_i32 = arith.constant 0 : i32
    %c0_i32_0 = arith.constant 0 : i32
    %c0_i32_1 = arith.constant 0 : i32
    return %c0_i32, %c0_i32_0 : i32, i32
  }
  func.func @transform_2(%arg0: i32) -> (i32, i32) {
    %c0_i32 = arith.constant 0 : i32
    %c0_i32_0 = arith.constant 0 : i32
    %c0_i32_1 = arith.constant 0 : i32
    return %c0_i32, %c0_i32_0 : i32, i32
  }
  func.func @transform_3(%arg0: i32) -> (i32, i32) {
    %c0_i32 = arith.constant 0 : i32
    %c0_i32_0 = arith.constant 0 : i32
    %c0_i32_1 = arith.constant 0 : i32
    return %c0_i32, %c0_i32_0 : i32, i32
  }
  func.func @transform_4(%arg0: i32) -> (i32, i32) {
    %c0_i32 = arith.constant 0 : i32
    %c0_i32_0 = arith.constant 0 : i32
    %c0_i32_1 = arith.constant 0 : i32
    return %c0_i32, %c0_i32_0 : i32, i32
  }
  func.func @transform_5(%arg0: i32) -> (i32, i32) {
    %c0_i32 = arith.constant 0 : i32
    %c0_i32_0 = arith.constant 0 : i32
    %c0_i32_1 = arith.constant 0 : i32
    return %c0_i32, %c0_i32_0 : i32, i32
  }
  func.func @transform_6(%arg0: i32) -> (i32, i32) {
    %c0_i32 = arith.constant 0 : i32
    %c0_i32_0 = arith.constant 0 : i32
    %c0_i32_1 = arith.constant 0 : i32
    return %c0_i32, %c0_i32_0 : i32, i32
  }
  func.func @transform_7(%arg0: i32) -> (i32, i32) {
    %c0_i32 = arith.constant 0 : i32
    %c0_i32_0 = arith.constant 0 : i32
    return %arg0, %c0_i32 : i32, i32
  }
}

</mosaic_0001>

<bundles_post_ra>
// kernel: neural_kalman_filter.1
= control target key start
LH: loop header
LB: loop body
LE: loop exit
PB: predicated region body
PF: predicated region fallthrough
CT: control target
= control target key end

     0   :  { %s1089_s24 = smov 0   ;;  %s1426_s0 = inlined_call_operand.vmem [shape: f32[512,10], index: 0, kind: input, shape index: {}]   ;;  %s1427_s1 = inlined_call_operand.vmem [shape: f32[10,128], index: 1, kind: input, shape index: {}]   ;;  %s1428_s2 = inlined_call_operand.vmem [shape: f32[1,128], index: 2, kind: input, shape index: {}]   ;;  %s1429_s3 = inlined_call_operand.vmem [shape: f32[128,128], index: 3, kind: input, shape index: {}]   ;;  %s1430_s4 = inlined_call_operand.vmem [shape: f32[1,128], index: 4, kind: input, shape index: {}]   ;;  %s1431_s5 = inlined_call_operand.vmem [shape: f32[128,128], index: 5, kind: input, shape index: {}]   ;;  %s1432_s6 = inlined_call_operand.vmem [shape: f32[1,128], index: 6, kind: input, shape index: {}]   ;;  %s1433_s7 = inlined_call_operand.vmem [shape: f32[512,128], index: 7, kind: output, shape index: {}]  }
   0x1 LB: > { %s952_s25 = sadd.s32 4294967295, %s1047_s24   ;;  %p956_p0 = scmp.ge.s32.totalorder %s1047_s24, 1  ;;  %s1047_s24 = sphi %s1089_s24, %s17_s24  }
   0x2   : > { %p238_p1 = scmp.lt.s32.totalorder %s1047_s24, 3 }
   0x4   : > { %p239_p2 = pnand %p956_p0, %p238_p1 }
   0x5   : > { %s957_s30 = sshll.u32 (!%p239_p2), %s952_s25, 5 }
   0x6   : > { %242 = sbr.rel (%p239_p2) target bundleno = 664 (0x298), region = 48  ;;  %p271_p3 = scmp.lt.s32.totalorder (!%p239_p2), %s957_s30, 63 }
   0xb   : > { %v315_v0 = vld [vmem:[%s1427_s1 + $0x8] sm:$0x3]  ;;  %vm417_vm0 = vcmask 1041408   ;;  %v314_v1 = vld [vmem:[%s1427_s1] sm:$0xff]  ;;  %s1435_s30 = smov (!%p271_p3, %s957_s30), 63  ;;  %vm320_vm1 = vcmask 80896  }
   0xc   : > { %961 = vmatpush.msk.msra.mxu0 %vm417_vm0, %v315_v0  ;;  %996 = vmatpush.msk.msra.mxu3 %vm417_vm0, %v315_v0  ;;  %s958_s8 = sshll.u32 %s1435_s30, 3  ;;  %v581_v11 = vld [vmem:[%s1429_s3 + $0x78] sm:$0xff]  ;;  %v580_v12 = vld [vmem:[%s1429_s3 + $0x70] sm:$0xff]  ;;  %v579_v13 = vld [vmem:[%s1429_s3 + $0x68] sm:$0xff] }
   0xd   : > { %s1111_s11 = scalar_lea.vmem %s1426_s0, %s958_s8  ;;  %586 = vmatpush.msra.mxu1 %v581_v11  ;;  %v578_v15 = vld [vmem:[%s1429_s3 + $0x60] sm:$0xff]  ;;  %v577_v16 = vld [vmem:[%s1429_s3 + $0x58] sm:$0xff]  ;;  %v576_v17 = vld [vmem:[%s1429_s3 + $0x50] sm:$0xff] }
   0xe   : > { %436 = vmatpush.msra.mxu0 %v314_v1  ;;  %997 = vmatpush.msra.mxu3 %v314_v1  ;;  %v282_v2 = vld [vmem:[%s1111_s11] sm:$0xff]  ;;  %v283_v3 = vld [vmem:[%s1111_s11 + $0x8] sm:$0xff]  ;;  %v284_v4 = vld [vmem:[%s1111_s11 + $0x10] sm:$0xff] }
   0xf   : > { %962 = vmatmul.msk.f32.vlgmr.msra.gmra.mxu0 %vm320_vm1, %v282_v2  ;;  %v285_v5 = vld [vmem:[%s1111_s11 + $0x18] sm:$0xff]  ;;  %v286_v6 = vld [vmem:[%s1111_s11 + $0x20] sm:$0xff]  ;;  %v287_v7 = vld [vmem:[%s1111_s11 + $0x28] sm:$0xff]  ;;  %587 = vmatpush.msra.mxu1 %v580_v12 }
  0x10   : > { %v288_v8 = vld [vmem:[%s1111_s11 + $0x30] sm:$0xff]  ;;  %v289_v9 = vld [vmem:[%s1111_s11 + $0x38] sm:$0xff]  ;;  %v290_v10 = vld [vmem:[%s1111_s11 + $0x40] sm:$0xff]  ;;  %998 = vmatpush.msrb.mxu3 %v581_v11 }
  0x11   : > { %v291_v14 = vld [vmem:[%s1111_s11 + $0x48] sm:$0xff]  ;;  %588 = vmatpush.msra.mxu1 %v579_v13  ;;  %v292_v19 = vld [vmem:[%s1111_s11 + $0x50] sm:$0xff]  ;;  %v574_v20 = vld [vmem:[%s1429_s3 + $0x40] sm:$0xff] }
  0x12   : > { %999 = vmatpush.msrb.mxu3 %v580_v12  ;;  %v575_v18 = vld [vmem:[%s1429_s3 + $0x48] sm:$0xff]  ;;  %v573_v21 = vld [vmem:[%s1429_s3 + $0x38] sm:$0xff]  ;;  %v572_v22 = vld [vmem:[%s1429_s3 + $0x30] sm:$0xff] }
  0x13   : > { %589 = vmatpush.msra.mxu1 %v578_v15  ;;  %v571_v23 = vld [vmem:[%s1429_s3 + $0x28] sm:$0xff]  ;;  %v293_v24 = vld [vmem:[%s1111_s11 + $0x58] sm:$0xff]  ;;  %v570_v25 = vld [vmem:[%s1429_s3 + $0x20] sm:$0xff] }
  0x14   : > { %1000 = vmatpush.msrb.mxu3 %v579_v13  ;;  %v569_v26 = vld [vmem:[%s1429_s3 + $0x18] sm:$0xff]  ;;  %v568_v27 = vld [vmem:[%s1429_s3 + $0x10] sm:$0xff]  ;;  %v294_v28 = vld [vmem:[%s1111_s11 + $0x60] sm:$0xff] }
  0x15   : > { %590 = vmatpush.msra.mxu1 %v577_v16  ;;  %v567_v29 = vld [vmem:[%s1429_s3 + $0x8] sm:$0xff]  ;;  %v566_v30 = vld [vmem:[%s1429_s3] sm:$0xff]  ;;  %v296_v32 = vld [vmem:[%s1111_s11 + $0x70] sm:$0xff] }
  0x16   : > { %1001 = vmatpush.msrb.mxu3 %v578_v15  ;;  %v295_v31 = vld [vmem:[%s1111_s11 + $0x68] sm:$0xff]  ;;  %v297_v33 = vld [vmem:[%s1111_s11 + $0x78] sm:$0xff]  ;;  %v1196_v34 = vld [vmem:[%s1428_s2] ss:$0 sm:$0xff] }
  0x17   : > { %963 = vmatmul.msk.f32.gmra.mxu0 %vm320_vm1, %v283_v3  ;;  %591 = vmatpush.msra.mxu1 %v576_v17  ;;  %v298_v36 = vld [vmem:[%s1111_s11 + $0x80] sm:$0xff]  ;;  %v299_v40 = vld [vmem:[%s1111_s11 + $0x88] sm:$0xff]  ;;  %v300_v44 = vld [vmem:[%s1111_s11 + $0x90] sm:$0xff] }
  0x18   : > { %1002 = vmatpush.msrb.mxu3 %v577_v16  ;;  %v301_v48 = vld [vmem:[%s1111_s11 + $0x98] sm:$0xff]  ;;  %v302_v52 = vld [vmem:[%s1111_s11 + $0xa0] sm:$0xff]  ;;  %v303_v56 = vld [vmem:[%s1111_s11 + $0xa8] sm:$0xff] }
  0x19   : > { %592 = vmatpush.msra.mxu1 %v575_v18  ;;  %v308_v59 = vld [vmem:[%s1111_s11 + $0xd0] sm:$0xff]  ;;  %v309_v0 = vld [vmem:[%s1111_s11 + $0xd8] sm:$0xff]  ;;  %v307_v13 = vld [vmem:[%s1111_s11 + $0xc8] sm:$0xff] }
  0x1a   : > { %1003 = vmatpush.msrb.mxu3 %v576_v17  ;;  %v304_v61 = vld [vmem:[%s1111_s11 + $0xb0] sm:$0xff]  ;;  %v305_v2 = vld [vmem:[%s1111_s11 + $0xb8] sm:$0xff]  ;;  %v744_v17 = vld [vmem:[%s1431_s5 + $0x68] sm:$0xff] }
  0x1b   : > { %593 = vmatpush.msra.mxu1 %v574_v20  ;;  %988 = vmatmul.msk.f32.vlgmr.msra.gmra.mxu3 %vm320_vm1, %v308_v59  ;;  %v746_v11 = vld [vmem:[%s1431_s5 + $0x78] sm:$0xff]  ;;  %v745_v15 = vld [vmem:[%s1431_s5 + $0x70] sm:$0xff] }
  0x1c   : > { %1004 = vmatpush.msrb.mxu3 %v575_v18  ;;  %751 = vmatpush.msra.mxu2 %v746_v11  ;;  %v312_v18 = vld [vmem:[%s1111_s11 + $0xf0] sm:$0xff] }
  0x1d   : > { %594 = vmatpush.msra.mxu1 %v573_v21 }
  0x1e   : > { %1005 = vmatpush.msrb.mxu3 %v574_v20  ;;  %752 = vmatpush.msra.mxu2 %v745_v15  ;;  %v742_v20 = vld [vmem:[%s1431_s5 + $0x58] sm:$0xff] }
  0x1f   : > { %964 = vmatmul.msk.f32.gmra.mxu0 %vm320_vm1, %v284_v4  ;;  %595 = vmatpush.msra.mxu1 %v572_v22 }
  0x20   : > { %1006 = vmatpush.msrb.mxu3 %v573_v21  ;;  %753 = vmatpush.msra.mxu2 %v744_v17 }
  0x21   : > { %596 = vmatpush.msra.mxu1 %v571_v23 }
  0x22   : > { %1007 = vmatpush.msrb.mxu3 %v572_v22 }
  0x23   : > { %597 = vmatpush.msra.mxu1 %v570_v25  ;;  %989 = vmatmul.msk.f32.gmra.mxu3 %vm320_vm1, %v309_v0 }
  0x24   : > { %1008 = vmatpush.msrb.mxu3 %v571_v23  ;;  %v741_v23 = vld [vmem:[%s1431_s5 + $0x50] sm:$0xff] }
  0x25   : > { %598 = vmatpush.msra.mxu1 %v569_v26 }
  0x26   : > { %1009 = vmatpush.msrb.mxu3 %v570_v25  ;;  %v740_v25 = vld [vmem:[%s1431_s5 + $0x48] sm:$0xff] }
  0x27   : > { %965 = vmatmul.msk.f32.gmra.mxu0 %vm320_vm1, %v285_v5  ;;  %599 = vmatpush.msra.mxu1 %v568_v27  ;;  %v310_v5 = vld [vmem:[%s1111_s11 + $0xe0] sm:$0xff] }
  0x28   : > { %1010 = vmatpush.msrb.mxu3 %v569_v26  ;;  %v313_v26 = vld [vmem:[%s1111_s11 + $0xf8] sm:$0xff] }
  0x29   : > { %600 = vmatpush.msra.mxu1 %v567_v29 }
  0x2a   : > { %1011 = vmatpush.msrb.mxu3 %v568_v27  ;;  %v739_v27 = vld [vmem:[%s1431_s5 + $0x40] sm:$0xff] }
  0x2b   : > { %601 = vmatpush.msra.mxu1 %v566_v30  ;;  %990 = vmatmul.msk.f32.gmra.mxu3 %vm320_vm1, %v310_v5 }
  0x2c   : > { %1012 = vmatpush.msrb.mxu3 %v567_v29 }
  0x2e   : > { %1013 = vmatpush.msrb.mxu3 %v566_v30 }
  0x2f   : > { %966 = vmatmul.msk.f32.gmra.mxu0 %vm320_vm1, %v286_v6 }
  0x30   : > { %1014 = vmatpush.msra.mxu3 %v746_v11 }
  0x32   : > { %1015 = vmatpush.msra.mxu3 %v745_v15 }
  0x34   : > { %1016 = vmatpush.msra.mxu3 %v744_v17 }
  0x37   : > { %967 = vmatmul.msk.f32.gmra.mxu0 %vm320_vm1, %v287_v7  ;;  %v306_v7 = vld [vmem:[%s1111_s11 + $0xc0] sm:$0xff] }
  0x3f   : > { %968 = vmatmul.msk.f32.gmra.mxu0 %vm320_vm1, %v288_v8 }
  0x47   : > { %969 = vmatmul.msk.f32.gmra.mxu0 %vm320_vm1, %v289_v9 }
  0x4f   : > { %970 = vmatmul.msk.f32.gmra.mxu0 %vm320_vm1, %v290_v10  ;;  %v311_v10 = vld [vmem:[%s1111_s11 + $0xe8] sm:$0xff]  ;;  %s1342_s11 = scalar_lea.vmem %s1433_s7, %s958_s8 }
  0x50   : > { %991 = vmatmul.msk.f32.gmra.mxu3 %vm320_vm1, %v311_v10 }
  0x57   : > { %971 = vmatmul.msk.f32.gmra.mxu0 %vm320_vm1, %v291_v14 }
  0x58   : > { %992 = vmatmul.msk.f32.gmra.mxu3 %vm320_vm1, %v312_v18 }
  0x5f   : > { %972 = vmatmul.msk.f32.gmra.mxu0 %vm320_vm1, %v292_v19  ;;  %v743_v19 = vld [vmem:[%s1431_s5 + $0x60] sm:$0xff] }
  0x60   : > { %754 = vmatpush.msra.mxu2 %v743_v19  ;;  %1017 = vmatpush.msra.mxu3 %v743_v19 }
  0x61   : > { %993 = vmatmul.msk.f32.gmra.mxu3 %vm320_vm1, %v313_v26 }
  0x62   : > { %755 = vmatpush.msra.mxu2 %v742_v20  ;;  %1018 = vmatpush.msra.mxu3 %v742_v20 }
  0x64   : > { %756 = vmatpush.msra.mxu2 %v741_v23  ;;  %1019 = vmatpush.msra.mxu3 %v741_v23 }
  0x66   : > { %757 = vmatpush.msra.mxu2 %v740_v25  ;;  %1020 = vmatpush.msra.mxu3 %v740_v25 }
  0x67   : > { %973 = vmatmul.msk.f32.gmra.mxu0 %vm320_vm1, %v293_v24 }
  0x68   : > { %758 = vmatpush.msra.mxu2 %v739_v27  ;;  %1021 = vmatpush.msra.mxu3 %v739_v27 }
  0x6f   : > { %974 = vmatmul.msk.f32.gmra.mxu0 %vm320_vm1, %v294_v28  ;;  %v738_v28 = vld [vmem:[%s1431_s5 + $0x38] sm:$0xff] }
  0x70   : > { %759 = vmatpush.msra.mxu2 %v738_v28  ;;  %1022 = vmatpush.msra.mxu3 %v738_v28 }
  0x77   : > { %975 = vmatmul.msk.f32.gmra.mxu0 %vm320_vm1, %v295_v31  ;;  %v737_v31 = vld [vmem:[%s1431_s5 + $0x30] sm:$0xff] }
  0x78   : > { %760 = vmatpush.msra.mxu2 %v737_v31  ;;  %1023 = vmatpush.msra.mxu3 %v737_v31 }
  0x7f   : > { %976 = vmatmul.msk.f32.gmra.mxu0 %vm320_vm1, %v296_v32 }
  0x87   : > { %977 = vmatmul.msk.f32.gmra.mxu0 %vm320_vm1, %v297_v33  ;;  %v736_v33 = vld [vmem:[%s1431_s5 + $0x28] sm:$0xff] }
  0x88   : > { %761 = vmatpush.msra.mxu2 %v736_v33  ;;  %1024 = vmatpush.msra.mxu3 %v736_v33 }
  0x8c   : > { %v438_v35 = vpop.f32.mrf.mxu0 }
  0x8d   : > { %v439_v37 = vadd.f32 %v1196_v34, %v438_v35  ;;  %v735_v35 = vld [vmem:[%s1431_s5 + $0x20] sm:$0xff] }
  0x8e   : > { %762 = vmatpush.msra.mxu2 %v735_v35  ;;  %1025 = vmatpush.msra.mxu3 %v735_v35 }
  0x8f   : > { %978 = vmatmul.msk.f32.gmra.mxu0 %vm320_vm1, %v298_v36  ;;  %v534_v38 = vmax.f32 %v439_v37, 0.0  ;;  %v734_v36 = vld [vmem:[%s1431_s5 + $0x18] sm:$0xff] }
  0x90   : > { %763 = vmatpush.msra.mxu2 %v734_v36  ;;  %1026 = vmatpush.msra.mxu3 %v734_v36 }
  0x91   : > { %602 = vmatmul.f32.vlgmr.msra.gmra.mxu1 %v534_v38 }
  0x94   : > { %v441_v39 = vpop.f32.mrf.mxu0 }
  0x95   : > { %v442_v41 = vadd.f32 %v1196_v34, %v441_v39  ;;  %v733_v39 = vld [vmem:[%s1431_s5 + $0x10] sm:$0xff] }
  0x96   : > { %764 = vmatpush.msra.mxu2 %v733_v39  ;;  %1027 = vmatpush.msra.mxu3 %v733_v39 }
  0x97   : > { %979 = vmatmul.msk.f32.gmra.mxu0 %vm320_vm1, %v299_v40  ;;  %v535_v42 = vmax.f32 %v442_v41, 0.0  ;;  %v732_v41 = vld [vmem:[%s1431_s5 + $0x8] sm:$0xff] }
  0x98   : > { %765 = vmatpush.msra.mxu2 %v732_v41  ;;  %1028 = vmatpush.msra.mxu3 %v732_v41 }
  0x99   : > { %605 = vmatmul.f32.gmra.mxu1 %v535_v42  ;;  %v731_v42 = vld [vmem:[%s1431_s5] sm:$0xff] }
  0x9a   : > { %766 = vmatpush.msra.mxu2 %v731_v42  ;;  %1029 = vmatpush.msra.mxu3 %v731_v42 }
  0x9c   : > { %v444_v43 = vpop.f32.mrf.mxu0 }
  0x9d   : > { %v445_v45 = vadd.f32 %v1196_v34, %v444_v43 }
  0x9e   : > { %v516_v39 = vpop.f32.mrf.mxu3 }
  0x9f   : > { %v536_v46 = vmax.f32 %v445_v45, 0.0  ;;  %980 = vmatmul.msk.f32.gmra.mxu0 %vm320_vm1, %v300_v44 }
  0xa1   : > { %608 = vmatmul.f32.gmra.mxu1 %v536_v46 }
  0xa4   : > { %v447_v47 = vpop.f32.mrf.mxu0 }
  0xa5   : > { %v448_v49 = vadd.f32 %v1196_v34, %v447_v47 }
  0xa7   : > { %v537_v50 = vmax.f32 %v448_v49, 0.0  ;;  %981 = vmatmul.msk.f32.gmra.mxu0 %vm320_vm1, %v301_v48 }
  0xa9   : > { %611 = vmatmul.f32.gmra.mxu1 %v537_v50 }
  0xac   : > { %v450_v51 = vpop.f32.mrf.mxu0 }
  0xad   : > { %v451_v53 = vadd.f32 %v1196_v34, %v450_v51 }
  0xaf   : > { %v538_v54 = vmax.f32 %v451_v53, 0.0  ;;  %982 = vmatmul.msk.f32.gmra.mxu0 %vm320_vm1, %v302_v52  ;;  %v1297_v52 = vld [vmem:[%s1430_s4] ss:$0 sm:$0xff] }
  0xb1   : > { %614 = vmatmul.f32.gmra.mxu1 %v538_v54 }
  0xb4   : > { %v453_v55 = vpop.f32.mrf.mxu0 }
  0xb5   : > { %v454_v57 = vadd.f32 %v1196_v34, %v453_v55 }
  0xb7   : > { %v539_v58 = vmax.f32 %v454_v57, 0.0  ;;  %983 = vmatmul.msk.f32.gmra.mxu0 %vm320_vm1, %v303_v56 }
  0xb9   : > { %617 = vmatmul.f32.gmra.mxu1 %v539_v58 }
  0xbc   : > { %v456_v60 = vpop.f32.mrf.mxu0 }
  0xbd   : > { %v457_v62 = vadd.f32 %v1196_v34, %v456_v60 }
  0xbf   : > { %v540_v63 = vmax.f32 %v457_v62, 0.0  ;;  %984 = vmatmul.msk.f32.gmra.mxu0 %vm320_vm1, %v304_v61 }
  0xc1   : > { %620 = vmatmul.f32.gmra.mxu1 %v540_v63 }
  0xc4   : > { %v459_v1 = vpop.f32.mrf.mxu0 }
  0xc5   : > { %v460_v3 = vadd.f32 %v1196_v34, %v459_v1 }
  0xc7   : > { %v541_v4 = vmax.f32 %v460_v3, 0.0  ;;  %985 = vmatmul.msk.f32.gmra.mxu0 %vm320_vm1, %v305_v2 }
  0xc9   : > { %623 = vmatmul.f32.gmra.mxu1 %v541_v4 }
  0xcc   : > { %v462_v6 = vpop.f32.mrf.mxu0 }
  0xcd   : > { %v463_v8 = vadd.f32 %v1196_v34, %v462_v6 }
  0xcf   : > { %v542_v9 = vmax.f32 %v463_v8, 0.0  ;;  %986 = vmatmul.msk.f32.gmra.mxu0 %vm320_vm1, %v306_v7 }
  0xd1   : > { %626 = vmatmul.f32.gmra.mxu1 %v542_v9 }
  0xd4   : > { %v465_v12 = vpop.f32.mrf.mxu0 }
  0xd5   : > { %v466_v14 = vadd.f32 %v1196_v34, %v465_v12 }
  0xd7   : > { %v543_v16 = vmax.f32 %v466_v14, 0.0  ;;  %987 = vmatmul.msk.f32.gmra.mxu0 %vm320_vm1, %v307_v13 }
  0xd9   : > { %629 = vmatmul.f32.gmra.mxu1 %v543_v16 }
  0xdc   : > { %v468_v21 = vpop.f32.mrf.mxu0 }
  0xdd   : > { %v469_v22 = vadd.f32 %v1196_v34, %v468_v21 }
  0xdf   : > { %v544_v24 = vmax.f32 %v469_v22, 0.0 }
  0xe1   : > { %632 = vmatmul.f32.gmra.mxu1 %v544_v24 }
  0xe4   : > { %v471_v29 = vpop.f32.mrf.mxu0 }
  0xe5   : > { %v472_v30 = vadd.f32 %v1196_v34, %v471_v29 }
  0xe7   : > { %v545_v32 = vmax.f32 %v472_v30, 0.0 }
  0xe9   : > { %635 = vmatmul.f32.gmra.mxu1 %v545_v32 }
  0xec   : > { %v474_v37 = vpop.f32.mrf.mxu0 }
  0xed   : > { %v475_v38 = vadd.f32 %v1196_v34, %v474_v37 }
  0xef   : > { %v546_v40 = vmax.f32 %v475_v38, 0.0 }
  0xf1   : > { %638 = vmatmul.f32.gmra.mxu1 %v546_v40 }
  0xf4   : > { %v477_v43 = vpop.f32.mrf.mxu0 }
  0xf5   : > { %v478_v44 = vadd.f32 %v1196_v34, %v477_v43 }
  0xf7   : > { %v547_v45 = vmax.f32 %v478_v44, 0.0 }
  0xf9   : > { %641 = vmatmul.f32.gmra.mxu1 %v547_v45 }
  0xfc   : > { %v480_v46 = vpop.f32.mrf.mxu0 }
  0xfd   : > { %v481_v47 = vadd.f32 %v1196_v34, %v480_v46 }
  0xff   : > { %v548_v48 = vmax.f32 %v481_v47, 0.0 }
 0x101   : > { %644 = vmatmul.f32.gmra.mxu1 %v548_v48  ;;  %v519_v48 = vpop.f32.mrf.mxu3 }
 0x104   : > { %v483_v49 = vpop.f32.mrf.mxu0 }
 0x105   : > { %v484_v50 = vadd.f32 %v1196_v34, %v483_v49 }
 0x107   : > { %v549_v51 = vmax.f32 %v484_v50, 0.0 }
 0x109   : > { %647 = vmatmul.f32.gmra.mxu1 %v549_v51 }
 0x10c   : > { %v486_v53 = vpop.f32.mrf.mxu0 }
 0x10d   : > { %v487_v54 = vadd.f32 %v1196_v34, %v486_v53  ;;  %v517_v53 = vadd.f32 %v1196_v34, %v516_v39 }
 0x10e   : > { %v603_v55 = vpop.f32.mrf.mxu1 }
 0x10f   : > { %v550_v56 = vmax.f32 %v487_v54, 0.0  ;;  %v604_v57 = vadd.f32 %v1297_v52, %v603_v55  ;;  %v560_v54 = vmax.f32 %v517_v53, 0.0 }
 0x111   : > { %v699_v58 = vmax.f32 %v604_v57, 0.0  ;;  %650 = vmatmul.f32.gmra.mxu1 %v550_v56  ;;  %v522_v57 = vpop.f32.mrf.mxu3 }
 0x113   : > { %767 = vmatmul.f32.vlgmr.msra.gmra.mxu2 %v699_v58 }
 0x114   : > { %v489_v59 = vpop.f32.mrf.mxu0 }
 0x115   : > { %v490_v60 = vadd.f32 %v1196_v34, %v489_v59  ;;  %v520_v59 = vadd.f32 %v1196_v34, %v519_v48 }
 0x116   : > { %v606_v61 = vpop.f32.mrf.mxu1 }
 0x117   : > { %v551_v62 = vmax.f32 %v490_v60, 0.0  ;;  %v607_v63 = vadd.f32 %v1297_v52, %v606_v61  ;;  %v561_v60 = vmax.f32 %v520_v59, 0.0 }
 0x119   : > { %v700_v0 = vmax.f32 %v607_v63, 0.0  ;;  %653 = vmatmul.f32.gmra.mxu1 %v551_v62 }
 0x11b   : > { %770 = vmatmul.f32.gmra.mxu2 %v700_v0  ;;  %v523_v0 = vadd.f32 %v1196_v34, %v522_v57 }
 0x11c   : > { %v492_v1 = vpop.f32.mrf.mxu0 }
 0x11d   : > { %v493_v2 = vadd.f32 %v1196_v34, %v492_v1  ;;  %v525_v1 = vpop.f32.mrf.mxu3 }
 0x11e   : > { %v609_v3 = vpop.f32.mrf.mxu1 }
 0x11f   : > { %v552_v4 = vmax.f32 %v493_v2, 0.0  ;;  %v610_v5 = vadd.f32 %v1297_v52, %v609_v3  ;;  %v562_v2 = vmax.f32 %v523_v0, 0.0 }
 0x121   : > { %v701_v6 = vmax.f32 %v610_v5, 0.0  ;;  %656 = vmatmul.f32.gmra.mxu1 %v552_v4 }
 0x123   : > { %773 = vmatmul.f32.gmra.mxu2 %v701_v6  ;;  %v526_v6 = vadd.f32 %v1196_v34, %v525_v1 }
 0x124   : > { %v495_v7 = vpop.f32.mrf.mxu0 }
 0x125   : > { %v496_v8 = vadd.f32 %v1196_v34, %v495_v7  ;;  %v528_v7 = vpop.f32.mrf.mxu3 }
 0x126   : > { %v612_v9 = vpop.f32.mrf.mxu1 }
 0x127   : > { %v553_v10 = vmax.f32 %v496_v8, 0.0  ;;  %v613_v11 = vadd.f32 %v1297_v52, %v612_v9  ;;  %v563_v8 = vmax.f32 %v526_v6, 0.0 }
 0x129   : > { %v702_v12 = vmax.f32 %v613_v11, 0.0  ;;  %659 = vmatmul.f32.gmra.mxu1 %v553_v10 }
 0x12b   : > { %776 = vmatmul.f32.gmra.mxu2 %v702_v12  ;;  %v529_v12 = vadd.f32 %v1196_v34, %v528_v7 }
 0x12c   : > { %v498_v13 = vpop.f32.mrf.mxu0 }
 0x12d   : > { %v499_v14 = vadd.f32 %v1196_v34, %v498_v13  ;;  %v564_v13 = vmax.f32 %v529_v12, 0.0 }
 0x12e   : > { %v615_v15 = vpop.f32.mrf.mxu1 }
 0x12f   : > { %v554_v16 = vmax.f32 %v499_v14, 0.0  ;;  %v616_v17 = vadd.f32 %v1297_v52, %v615_v15  ;;  %v531_v15 = vpop.f32.mrf.mxu3 }
 0x131   : > { %v703_v18 = vmax.f32 %v616_v17, 0.0  ;;  %662 = vmatmul.f32.gmra.mxu1 %v554_v16 }
 0x133   : > { %779 = vmatmul.f32.gmra.mxu2 %v703_v18  ;;  %v532_v18 = vadd.f32 %v1196_v34, %v531_v15 }
 0x134   : > { %v501_v19 = vpop.f32.mrf.mxu0 }
 0x135   : > { %v502_v20 = vadd.f32 %v1196_v34, %v501_v19  ;;  %v565_v19 = vmax.f32 %v532_v18, 0.0 }
 0x136   : > { %v618_v21 = vpop.f32.mrf.mxu1 }
 0x137   : > { %v555_v22 = vmax.f32 %v502_v20, 0.0  ;;  %v619_v23 = vadd.f32 %v1297_v52, %v618_v21 }
 0x139   : > { %v704_v24 = vmax.f32 %v619_v23, 0.0  ;;  %665 = vmatmul.f32.gmra.mxu1 %v555_v22 }
 0x13b   : > { %782 = vmatmul.f32.gmra.mxu2 %v704_v24 }
 0x13c   : > { %v504_v25 = vpop.f32.mrf.mxu0 }
 0x13d   : > { %v505_v26 = vadd.f32 %v1196_v34, %v504_v25 }
 0x13e   : > { %v621_v27 = vpop.f32.mrf.mxu1 }
 0x13f   : > { %v556_v28 = vmax.f32 %v505_v26, 0.0  ;;  %v622_v29 = vadd.f32 %v1297_v52, %v621_v27  ;;  %v1335_v26 = vld [vmem:[%s1432_s6] ss:$0 sm:$0xff] }
 0x141   : > { %v705_v30 = vmax.f32 %v622_v29, 0.0  ;;  %668 = vmatmul.f32.gmra.mxu1 %v556_v28 }
 0x143   : > { %785 = vmatmul.f32.gmra.mxu2 %v705_v30 }
 0x144   : > { %v507_v31 = vpop.f32.mrf.mxu0 }
 0x145   : > { %v508_v32 = vadd.f32 %v1196_v34, %v507_v31 }
 0x146   : > { %v624_v33 = vpop.f32.mrf.mxu1 }
 0x147   : > { %v557_v35 = vmax.f32 %v508_v32, 0.0  ;;  %v625_v36 = vadd.f32 %v1297_v52, %v624_v33 }
 0x149   : > { %v706_v37 = vmax.f32 %v625_v36, 0.0  ;;  %671 = vmatmul.f32.gmra.mxu1 %v557_v35 }
 0x14b   : > { %788 = vmatmul.f32.gmra.mxu2 %v706_v37 }
 0x14c   : > { %v510_v38 = vpop.f32.mrf.mxu0 }
 0x14d   : > { %v511_v40 = vadd.f32 %v1196_v34, %v510_v38 }
 0x14e   : > { %v627_v41 = vpop.f32.mrf.mxu1 }
 0x14f   : > { %v558_v42 = vmax.f32 %v511_v40, 0.0  ;;  %v628_v43 = vadd.f32 %v1297_v52, %v627_v41 }
 0x151   : > { %v707_v44 = vmax.f32 %v628_v43, 0.0  ;;  %674 = vmatmul.f32.vlgmr.msrb.gmra.mxu3 %v558_v42 }
 0x153   : > { %791 = vmatmul.f32.gmra.mxu2 %v707_v44 }
 0x154   : > { %v513_v45 = vpop.f32.mrf.mxu0 }
 0x155   : > { %v514_v46 = vadd.f32 %v1196_v34, %v513_v45 }
 0x156   : > { %v630_v47 = vpop.f32.mrf.mxu1 }
 0x157   : > { %v559_v49 = vmax.f32 %v514_v46, 0.0  ;;  %v631_v50 = vadd.f32 %v1297_v52, %v630_v47 }
 0x159   : > { %v708_v51 = vmax.f32 %v631_v50, 0.0  ;;  %677 = vmatmul.f32.gmra.mxu3 %v559_v49 }
 0x15b   : > { %794 = vmatmul.f32.gmra.mxu2 %v708_v51 }
 0x15e   : > { %v633_v55 = vpop.f32.mrf.mxu1 }
 0x15f   : > { %v634_v56 = vadd.f32 %v1297_v52, %v633_v55 }
 0x161   : > { %v709_v58 = vmax.f32 %v634_v56, 0.0  ;;  %680 = vmatmul.f32.gmra.mxu3 %v560_v54 }
 0x163   : > { %797 = vmatmul.f32.gmra.mxu2 %v709_v58 }
 0x166   : > { %v636_v61 = vpop.f32.mrf.mxu1 }
 0x167   : > { %v637_v62 = vadd.f32 %v1297_v52, %v636_v61 }
 0x169   : > { %v710_v63 = vmax.f32 %v637_v62, 0.0  ;;  %683 = vmatmul.f32.gmra.mxu3 %v561_v60 }
 0x16b   : > { %800 = vmatmul.f32.gmra.mxu2 %v710_v63 }
 0x16e   : > { %v639_v3 = vpop.f32.mrf.mxu1 }
 0x16f   : > { %v640_v4 = vadd.f32 %v1297_v52, %v639_v3 }
 0x171   : > { %v711_v5 = vmax.f32 %v640_v4, 0.0  ;;  %686 = vmatmul.f32.gmra.mxu3 %v562_v2 }
 0x173   : > { %803 = vmatmul.f32.gmra.mxu2 %v711_v5 }
 0x176   : > { %v642_v9 = vpop.f32.mrf.mxu1 }
 0x177   : > { %v643_v10 = vadd.f32 %v1297_v52, %v642_v9 }
 0x179   : > { %v712_v11 = vmax.f32 %v643_v10, 0.0  ;;  %689 = vmatmul.f32.gmra.mxu3 %v563_v8 }
 0x17b   : > { %806 = vmatmul.f32.gmra.mxu2 %v712_v11 }
 0x17e   : > { %v645_v14 = vpop.f32.mrf.mxu1 }
 0x17f   : > { %v646_v16 = vadd.f32 %v1297_v52, %v645_v14 }
 0x181   : > { %v713_v17 = vmax.f32 %v646_v16, 0.0  ;;  %692 = vmatmul.f32.gmra.mxu3 %v564_v13 }
 0x183   : > { %809 = vmatmul.f32.gmra.mxu2 %v713_v17 }
 0x186   : > { %v648_v20 = vpop.f32.mrf.mxu1 }
 0x187   : > { %v649_v21 = vadd.f32 %v1297_v52, %v648_v20 }
 0x189   : > { %v714_v22 = vmax.f32 %v649_v21, 0.0  ;;  %695 = vmatmul.f32.gmra.mxu3 %v565_v19 }
 0x18b   : > { %812 = vmatmul.f32.gmra.mxu2 %v714_v22 }
 0x18e   : > { %v651_v23 = vpop.f32.mrf.mxu1 }
 0x18f   : > { %v652_v24 = vadd.f32 %v1297_v52, %v651_v23 }
 0x191   : > { %v715_v25 = vmax.f32 %v652_v24, 0.0 }
 0x193   : > { %815 = vmatmul.f32.gmra.mxu2 %v715_v25 }
 0x196   : > { %v654_v27 = vpop.f32.mrf.mxu1  ;;  %v768_v34 = vpop.f32.mrf.mxu2 }
 0x197   : > { %v655_v28 = vadd.f32 %v1297_v52, %v654_v27  ;;  %v769_v29 = vadd.f32 %v1335_v26, %v768_v34 }
 0x199   : > { %v716_v30 = vmax.f32 %v655_v28, 0.0  ;;  %864 = vst [vmem:[%s1342_s11] sm:$0xff] %v769_v29 }
 0x19b   : > { %818 = vmatmul.f32.gmra.mxu2 %v716_v30 }
 0x19e   : > { %v657_v31 = vpop.f32.mrf.mxu1  ;;  %v771_v32 = vpop.f32.mrf.mxu2 }
 0x19f   : > { %v658_v33 = vadd.f32 %v1297_v52, %v657_v31  ;;  %v772_v35 = vadd.f32 %v1335_v26, %v771_v32 }
 0x1a1   : > { %v717_v36 = vmax.f32 %v658_v33, 0.0  ;;  %865 = vst [vmem:[%s1342_s11 + $0x8] sm:$0xff] %v772_v35 }
 0x1a3   : > { %821 = vmatmul.f32.gmra.mxu2 %v717_v36 }
 0x1a6   : > { %v660_v37 = vpop.f32.mrf.mxu1  ;;  %v774_v38 = vpop.f32.mrf.mxu2 }
 0x1a7   : > { %v661_v39 = vadd.f32 %v1297_v52, %v660_v37  ;;  %v775_v40 = vadd.f32 %v1335_v26, %v774_v38 }
 0x1a9   : > { %v718_v41 = vmax.f32 %v661_v39, 0.0  ;;  %866 = vst [vmem:[%s1342_s11 + $0x10] sm:$0xff] %v775_v40 }
 0x1ab   : > { %824 = vmatmul.f32.gmra.mxu2 %v718_v41 }
 0x1ae   : > { %v663_v42 = vpop.f32.mrf.mxu1  ;;  %v777_v43 = vpop.f32.mrf.mxu2 }
 0x1af   : > { %v664_v44 = vadd.f32 %v1297_v52, %v663_v42  ;;  %v778_v45 = vadd.f32 %v1335_v26, %v777_v43 }
 0x1b1   : > { %v719_v46 = vmax.f32 %v664_v44, 0.0  ;;  %867 = vst [vmem:[%s1342_s11 + $0x18] sm:$0xff] %v778_v45 }
 0x1b3   : > { %827 = vmatmul.f32.gmra.mxu2 %v719_v46 }
 0x1b6   : > { %v666_v47 = vpop.f32.mrf.mxu1  ;;  %v780_v48 = vpop.f32.mrf.mxu2 }
 0x1b7   : > { %v667_v49 = vadd.f32 %v1297_v52, %v666_v47  ;;  %v781_v50 = vadd.f32 %v1335_v26, %v780_v48 }
 0x1b9   : > { %v720_v51 = vmax.f32 %v667_v49, 0.0  ;;  %868 = vst [vmem:[%s1342_s11 + $0x20] sm:$0xff] %v781_v50 }
 0x1bb   : > { %830 = vmatmul.f32.gmra.mxu2 %v720_v51 }
 0x1be   : > { %v669_v53 = vpop.f32.mrf.mxu1  ;;  %v783_v54 = vpop.f32.mrf.mxu2 }
 0x1bf   : > { %v670_v55 = vadd.f32 %v1297_v52, %v669_v53  ;;  %v784_v56 = vadd.f32 %v1335_v26, %v783_v54 }
 0x1c1   : > { %v721_v57 = vmax.f32 %v670_v55, 0.0  ;;  %869 = vst [vmem:[%s1342_s11 + $0x28] sm:$0xff] %v784_v56 }
 0x1c3   : > { %833 = vmatmul.f32.gmra.mxu2 %v721_v57 }
 0x1c6   : > { %v672_v58 = vpop.f32.mrf.mxu1  ;;  %v786_v59 = vpop.f32.mrf.mxu2 }
 0x1c7   : > { %v673_v60 = vadd.f32 %v1297_v52, %v672_v58  ;;  %v787_v61 = vadd.f32 %v1335_v26, %v786_v59 }
 0x1c9   : > { %v722_v62 = vmax.f32 %v673_v60, 0.0  ;;  %870 = vst [vmem:[%s1342_s11 + $0x30] sm:$0xff] %v787_v61 }
 0x1cb   : > { %836 = vmatmul.f32.gmra.mxu2 %v722_v62 }
 0x1ce   : > { %v789_v63 = vpop.f32.mrf.mxu2 }
 0x1cf   : > { %v790_v0 = vadd.f32 %v1335_v26, %v789_v63 }
 0x1d1   : > { %871 = vst [vmem:[%s1342_s11 + $0x38] sm:$0xff] %v790_v0 }
 0x1d4   : > { %v675_v1 = vpop.f32.mrf.mxu3 }
 0x1d5   : > { %v676_v2 = vadd.f32 %v1297_v52, %v675_v1 }
 0x1d6   : > { %v792_v3 = vpop.f32.mrf.mxu2 }
 0x1d7   : > { %v723_v4 = vmax.f32 %v676_v2, 0.0  ;;  %v793_v5 = vadd.f32 %v1335_v26, %v792_v3 }
 0x1d9   : > { %872 = vst [vmem:[%s1342_s11 + $0x40] sm:$0xff] %v793_v5  ;;  %839 = vmatmul.f32.vlgmr.msra.gmra.mxu3 %v723_v4 }
 0x1dc   : > { %v678_v6 = vpop.f32.mrf.mxu3 }
 0x1dd   : > { %v679_v7 = vadd.f32 %v1297_v52, %v678_v6 }
 0x1de   : > { %v795_v8 = vpop.f32.mrf.mxu2 }
 0x1df   : > { %v724_v9 = vmax.f32 %v679_v7, 0.0  ;;  %v796_v10 = vadd.f32 %v1335_v26, %v795_v8 }
 0x1e1   : > { %873 = vst [vmem:[%s1342_s11 + $0x48] sm:$0xff] %v796_v10  ;;  %842 = vmatmul.f32.gmra.mxu3 %v724_v9 }
 0x1e4   : > { %v681_v11 = vpop.f32.mrf.mxu3 }
 0x1e5   : > { %v682_v12 = vadd.f32 %v1297_v52, %v681_v11 }
 0x1e6   : > { %v798_v13 = vpop.f32.mrf.mxu2 }
 0x1e7   : > { %v725_v14 = vmax.f32 %v682_v12, 0.0  ;;  %v799_v15 = vadd.f32 %v1335_v26, %v798_v13 }
 0x1e9   : > { %874 = vst [vmem:[%s1342_s11 + $0x50] sm:$0xff] %v799_v15  ;;  %845 = vmatmul.f32.gmra.mxu3 %v725_v14 }
 0x1ec   : > { %v684_v16 = vpop.f32.mrf.mxu3 }
 0x1ed   : > { %v685_v17 = vadd.f32 %v1297_v52, %v684_v16 }
 0x1ee   : > { %v801_v18 = vpop.f32.mrf.mxu2 }
 0x1ef   : > { %v726_v19 = vmax.f32 %v685_v17, 0.0  ;;  %v802_v20 = vadd.f32 %v1335_v26, %v801_v18 }
 0x1f1   : > { %875 = vst [vmem:[%s1342_s11 + $0x58] sm:$0xff] %v802_v20  ;;  %848 = vmatmul.f32.gmra.mxu3 %v726_v19 }
 0x1f4   : > { %v687_v21 = vpop.f32.mrf.mxu3 }
 0x1f5   : > { %v688_v22 = vadd.f32 %v1297_v52, %v687_v21 }
 0x1f6   : > { %v804_v23 = vpop.f32.mrf.mxu2 }
 0x1f7   : > { %v727_v24 = vmax.f32 %v688_v22, 0.0  ;;  %v805_v25 = vadd.f32 %v1335_v26, %v804_v23 }
 0x1f9   : > { %876 = vst [vmem:[%s1342_s11 + $0x60] sm:$0xff] %v805_v25  ;;  %851 = vmatmul.f32.gmra.mxu3 %v727_v24 }
 0x1fc   : > { %v690_v27 = vpop.f32.mrf.mxu3 }
 0x1fd   : > { %v691_v34 = vadd.f32 %v1297_v52, %v690_v27 }
 0x1fe   : > { %v807_v28 = vpop.f32.mrf.mxu2 }
 0x1ff   : > { %v728_v29 = vmax.f32 %v691_v34, 0.0  ;;  %v808_v30 = vadd.f32 %v1335_v26, %v807_v28 }
 0x201   : > { %877 = vst [vmem:[%s1342_s11 + $0x68] sm:$0xff] %v808_v30  ;;  %854 = vmatmul.f32.gmra.mxu3 %v728_v29 }
 0x204   : > { %v693_v31 = vpop.f32.mrf.mxu3 }
 0x205   : > { %v694_v32 = vadd.f32 %v1297_v52, %v693_v31 }
 0x206   : > { %v810_v33 = vpop.f32.mrf.mxu2 }
 0x207   : > { %v729_v35 = vmax.f32 %v694_v32, 0.0  ;;  %v811_v36 = vadd.f32 %v1335_v26, %v810_v33 }
 0x209   : > { %878 = vst [vmem:[%s1342_s11 + $0x70] sm:$0xff] %v811_v36  ;;  %857 = vmatmul.f32.gmra.mxu3 %v729_v35 }
 0x20c   : > { %v696_v37 = vpop.f32.mrf.mxu3 }
 0x20d   : > { %v697_v38 = vadd.f32 %v1297_v52, %v696_v37 }
 0x20e   : > { %v813_v39 = vpop.f32.mrf.mxu2 }
 0x20f   : > { %v730_v40 = vmax.f32 %v697_v38, 0.0  ;;  %v814_v41 = vadd.f32 %v1335_v26, %v813_v39 }
 0x211   : > { %879 = vst [vmem:[%s1342_s11 + $0x78] sm:$0xff] %v814_v41  ;;  %860 = vmatmul.f32.gmra.mxu3 %v730_v40 }
 0x216   : > { %v816_v42 = vpop.f32.mrf.mxu2 }
 0x217   : > { %v817_v43 = vadd.f32 %v1335_v26, %v816_v42 }
 0x219   : > { %880 = vst [vmem:[%s1342_s11 + $0x80] sm:$0xff] %v817_v43 }
 0x21e   : > { %v819_v44 = vpop.f32.mrf.mxu2 }
 0x21f   : > { %v820_v45 = vadd.f32 %v1335_v26, %v819_v44 }
 0x221   : > { %881 = vst [vmem:[%s1342_s11 + $0x88] sm:$0xff] %v820_v45 }
 0x226   : > { %v822_v46 = vpop.f32.mrf.mxu2 }
 0x227   : > { %v823_v52 = vadd.f32 %v1335_v26, %v822_v46 }
 0x229   : > { %882 = vst [vmem:[%s1342_s11 + $0x90] sm:$0xff] %v823_v52 }
 0x22e   : > { %v825_v47 = vpop.f32.mrf.mxu2 }
 0x22f   : > { %v826_v48 = vadd.f32 %v1335_v26, %v825_v47 }
 0x231   : > { %883 = vst [vmem:[%s1342_s11 + $0x98] sm:$0xff] %v826_v48 }
 0x236   : > { %v828_v49 = vpop.f32.mrf.mxu2 }
 0x237   : > { %v829_v50 = vadd.f32 %v1335_v26, %v828_v49 }
 0x239   : > { %884 = vst [vmem:[%s1342_s11 + $0xa0] sm:$0xff] %v829_v50 }
 0x23e   : > { %v831_v51 = vpop.f32.mrf.mxu2 }
 0x23f   : > { %v832_v53 = vadd.f32 %v1335_v26, %v831_v51 }
 0x241   : > { %885 = vst [vmem:[%s1342_s11 + $0xa8] sm:$0xff] %v832_v53 }
 0x246   : > { %v834_v54 = vpop.f32.mrf.mxu2 }
 0x247   : > { %v835_v55 = vadd.f32 %v1335_v26, %v834_v54 }
 0x249   : > { %886 = vst [vmem:[%s1342_s11 + $0xb0] sm:$0xff] %v835_v55 }
 0x24e   : > { %v837_v56 = vpop.f32.mrf.mxu2 }
 0x24f   : > { %v838_v57 = vadd.f32 %v1335_v26, %v837_v56 }
 0x251   : > { %887 = vst [vmem:[%s1342_s11 + $0xb8] sm:$0xff] %v838_v57 }
 0x25c   : > { %v840_v58 = vpop.f32.mrf.mxu3 }
 0x25d   : > { %v841_v59 = vadd.f32 %v1335_v26, %v840_v58 }
 0x25f   : > { %888 = vst [vmem:[%s1342_s11 + $0xc0] sm:$0xff] %v841_v59 }
 0x264   : > { %v843_v60 = vpop.f32.mrf.mxu3 }
 0x265   : > { %v844_v61 = vadd.f32 %v1335_v26, %v843_v60 }
 0x267   : > { %889 = vst [vmem:[%s1342_s11 + $0xc8] sm:$0xff] %v844_v61 }
 0x26c   : > { %v846_v62 = vpop.f32.mrf.mxu3 }
 0x26d   : > { %v847_v63 = vadd.f32 %v1335_v26, %v846_v62 }
 0x26f   : > { %890 = vst [vmem:[%s1342_s11 + $0xd0] sm:$0xff] %v847_v63 }
 0x274   : > { %v849_v0 = vpop.f32.mrf.mxu3 }
 0x275   : > { %v850_v1 = vadd.f32 %v1335_v26, %v849_v0 }
 0x277   : > { %891 = vst [vmem:[%s1342_s11 + $0xd8] sm:$0xff] %v850_v1 }
 0x27c   : > { %v852_v2 = vpop.f32.mrf.mxu3 }
 0x27d   : > { %v853_v3 = vadd.f32 %v1335_v26, %v852_v2 }
 0x27f   : > { %892 = vst [vmem:[%s1342_s11 + $0xe0] sm:$0xff] %v853_v3 }
 0x284   : > { %v855_v4 = vpop.f32.mrf.mxu3 }
 0x285   : > { %v856_v5 = vadd.f32 %v1335_v26, %v855_v4 }
 0x287   : > { %893 = vst [vmem:[%s1342_s11 + $0xe8] sm:$0xff] %v856_v5 }
 0x28c   : > { %v858_v6 = vpop.f32.mrf.mxu3 }
 0x28d   : > { %v859_v7 = vadd.f32 %v1335_v26, %v858_v6 }
 0x28f   : > { %894 = vst [vmem:[%s1342_s11 + $0xf0] sm:$0xff] %v859_v7 }
 0x294   : > { %v861_v8 = vpop.f32.mrf.mxu3 }
 0x295   : > { %v862_v9 = vadd.f32 %v1335_v26, %v861_v8 }
 0x297   : > { %895 = vst [vmem:[%s1342_s11 + $0xf8] sm:$0xff] %v862_v9 }
 0x298 PF: > { %s17_s24 = sadd.s32 1, %s1047_s24  }
 0x299   : > { %p14_p4 = scmp.ge.s32.totalorder %s17_s24, 4  }
 0x29b   :  { %16 = sbr.rel (!%p14_p4) target bundleno = 1 (0x1), region = 78 }

</bundles_post_ra>
